<compile_context>
chip_gen: v6e
topology: v6e:2x2x1
jax: 0.10.0
libtpu: 0.0.40
codegen_flags: <defaults>
</compile_context>

<pallas_src>
import jax
import jax.numpy as jnp
from jax.experimental import pallas as pl
from jax.experimental.pallas import tpu as pltpu

LANES = 128
SUBLANES = 8
NCORES = 2                     # leading grid axis (megacore split on v7x)
BYTES_PER_BLOCK = 4 << 20      # ~4 MiB per input block (f32: 8192 rows)


def _make_kernel(tile_rows, total_rows, blocks_per_core, needs_mask):

    def group_sum(x):
        # x: (rows, LANES) f32 -> (1, SUBLANES, LANES) partial sum.
        # Pure VPU adds along the vreg-group axis (no XLU cross-lane work).
        rows = x.shape[0]
        g, rem = divmod(rows, SUBLANES)
        if rem:
            # Tiny-input fallback: pad rows so the tile groups into (g, 8, 128).
            pad = jnp.zeros((SUBLANES - rem, LANES), jnp.float32)
            x = jnp.concatenate([x, pad], axis=0)
            g += 1
        if g % 4 == 0 and g >= 8:
            # Two-stage reduction: 4 interleaved (8,128) accumulator chains,
            # then a short 4-way combine.  Breaks the long serial vadd chain.
            x = x.reshape(g // 4, 4 * SUBLANES, LANES).sum(axis=0)
            x = x.reshape(4, SUBLANES, LANES).sum(axis=0)
        else:
            x = x.reshape(g, SUBLANES, LANES).sum(axis=0)
        return x[None]

    def kernel(pred_ref, target_ref, mask_ref, num_ref, den_ref):
        c = pl.program_id(0)
        j = pl.program_id(1)

        # Output blocks double as per-core accumulators (resident across j).
        @pl.when(j == 0)
        def _():
            num_ref[...] = jnp.zeros_like(num_ref)
            den_ref[...] = jnp.zeros_like(den_ref)

        p = pred_ref[...].astype(jnp.float32)
        t = target_ref[...].astype(jnp.float32)
        m = mask_ref[...].astype(jnp.float32)

        if not needs_mask:
            # Problem divides evenly: no masking work emitted at all.
            num_ref[...] += group_sum((t - p) * (t - p) * m)
            den_ref[...] += group_sum(m)
        else:
            start = (c * blocks_per_core + j) * tile_rows
            is_tail = start + tile_rows > total_rows

            @pl.when(jnp.logical_not(is_tail))
            def _():
                # Fast path for interior blocks: no iota / selects.
                num_ref[...] += group_sum((t - p) * (t - p) * m)
                den_ref[...] += group_sum(m)

            @pl.when(is_tail)
            def _():
                # Ragged last block and clamped duplicate blocks: mask rows
                # past the true row count.  Keep the select on the products so
                # unspecified OOB data (possible NaNs) cannot survive.
                row_ids = start + jax.lax.broadcasted_iota(
                    jnp.int32, (tile_rows, 1), 0)
                valid = row_ids < total_rows
                num_ref[...] += group_sum(
                    jnp.where(valid, (t - p) * (t - p) * m, 0.0))
                den_ref[...] += group_sum(jnp.where(valid, m, 0.0))

    return kernel


def masked_l2_loss(pred, target, valid_mask, *, tile_rows=None):
    assert pred.shape == target.shape == valid_mask.shape, \
        "inconsistent dimensions"

    total = pred.size

    fp = jnp.ravel(pred)        # native dtype, contiguous -> free reshape
    ft = jnp.ravel(target)
    fm = jnp.ravel(valid_mask)

    main = (total // LANES) * LANES
    tail_n = total - main

    # <128-element tail handled in the wrapper (no full-array pad copy).
    if tail_n:
        tp = fp[main:].astype(jnp.float32)
        tt = ft[main:].astype(jnp.float32)
        tm = fm[main:].astype(jnp.float32)
        tail_num = jnp.sum((tt - tp) * (tt - tp) * tm)
        tail_den = jnp.sum(tm)
    else:
        tail_num = jnp.float32(0.0)
        tail_den = jnp.float32(0.0)

    if main == 0:
        # Fewer than 128 elements: nothing for the kernel to do.
        return tail_num / tail_den

    def _rows(x):
        xr = x[:main] if tail_n else x
        return xr.reshape(-1, LANES)

    p2, t2, m2 = _rows(fp), _rows(ft), _rows(fm)
    M = p2.shape[0]

    # Dtype-aware tile size from a byte budget (~4 MiB per input block).
    itemsizes = [jnp.dtype(a.dtype).itemsize for a in (pred, target, valid_mask)]
    if tile_rows is None:
        tile_rows = BYTES_PER_BLOCK // (LANES * max(itemsizes))
    tile_rows = max(1, min(int(tile_rows), M))
    if tile_rows < M:
        # BlockSpec second-to-last dim must be a multiple of 8 unless full-dim.
        tile_rows = max(SUBLANES, (tile_rows // SUBLANES) * SUBLANES)

    total_blocks = pl.cdiv(M, tile_rows)
    ncores = NCORES if total_blocks >= NCORES else 1
    blocks_per_core = pl.cdiv(total_blocks, ncores)
    needs_mask = (M % tile_rows != 0) or (ncores * blocks_per_core != total_blocks)

    def in_map(c, j):
        # Clamp so a core with no remaining work re-reads the last block; the
        # kernel masks it out by logical row index, so it contributes zero.
        return (jnp.minimum(c * blocks_per_core + j, total_blocks - 1), 0)

    kernel = _make_kernel(tile_rows, M, blocks_per_core, needs_mask)
    in_blk = pl.BlockSpec((tile_rows, LANES), in_map)
    out_blk = pl.BlockSpec((1, SUBLANES, LANES), lambda c, j: (c, 0, 0))
    part_shape = jax.ShapeDtypeStruct((ncores, SUBLANES, LANES), jnp.float32)

    # 3 inputs x 2 pipeline buffers; set an explicit limit so the larger tiles
    # are legal on v5e's 16 MiB scoped default and safe on v7x's 64 MiB VMEM.
    vmem_need = 2 * tile_rows * LANES * sum(itemsizes)
    vmem_limit = int(min(max(vmem_need + (8 << 20), 32 << 20), 60 << 20))

    num_part, den_part = pl.pallas_call(
        kernel,
        out_shape=(part_shape, part_shape),
        grid_spec=pltpu.PrefetchScalarGridSpec(
            num_scalar_prefetch=0,
            grid=(ncores, blocks_per_core),
            in_specs=[in_blk, in_blk, in_blk],
            out_specs=[out_blk, out_blk],
        ),
        compiler_params=pltpu.CompilerParams(
            dimension_semantics=("parallel", "arbitrary"),
            vmem_limit_bytes=vmem_limit),
    )(p2, t2, m2)

    # Tiny final cross-lane reduce + divide.  Returns inf/NaN if
    # sum(valid_mask) == 0, matching the PyTorch reference's behavior.
    num = jnp.sum(num_part) + tail_num
    den = jnp.sum(den_part) + tail_den
    return num / den


if __name__ == "__main__":
    key = jax.random.PRNGKey(0)
    k1, k2, k3 = jax.random.split(key, 3)

    # NCHW, small shapes
    shape = (2, 4, 16, 16)
    pred = jax.random.normal(k1, shape, dtype=jnp.float32)
    target = jax.random.normal(k2, shape, dtype=jnp.float32)
    valid_mask = (jax.random.uniform(k3, shape) > 0.3).astype(jnp.float32)

    loss = masked_l2_loss(pred, target, valid_mask)
    loss = jax.block_until_ready(loss)

    # reference check in plain JAX
    ref = jnp.sum((target - pred) ** 2 * valid_mask) / jnp.sum(valid_mask)
    assert jnp.allclose(loss, ref, rtol=1e-5, atol=1e-6), (loss, ref)

    print("KERNEL_OK")
</pallas_src>

<mosaic_0001>
module attributes {stable_mosaic.version = 11 : i64} {
  func.func @kernel(%arg0: i32, %arg1: i32, %arg2: memref<16x128xf32, #tpu.memory_space<vmem>>, %arg3: memref<16x128xf32, #tpu.memory_space<vmem>>, %arg4: memref<16x128xf32, #tpu.memory_space<vmem>>, %arg5: memref<1x8x128xf32, #tpu.memory_space<vmem>>, %arg6: memref<1x8x128xf32, #tpu.memory_space<vmem>>) attributes {dimension_semantics = [#tpu.dimension_semantics<parallel>, #tpu.dimension_semantics<arbitrary>], iteration_bounds = array<i64: 1, 1>, scalar_prefetch = 0 : i64, scratch_operands = 0 : i64, tpu.core_type = #tpu.core_type<tc>, window_params = [{transform_indices = @transform_0, window_bounds = array<i64: 16, 128>}, {transform_indices = @transform_1, window_bounds = array<i64: 16, 128>}, {transform_indices = @transform_2, window_bounds = array<i64: 16, 128>}, {transform_indices = @transform_3, window_bounds = array<i64: 1, 8, 128>}, {transform_indices = @transform_4, window_bounds = array<i64: 1, 8, 128>}]} {
    %c0_i32 = arith.constant 0 : i32
    %0 = arith.cmpi eq, %arg1, %c0_i32 : i32
    %1 = arith.extui %0 : i1 to i32
    %c0_i32_0 = arith.constant 0 : i32
    %2 = arith.cmpi ne, %1, %c0_i32_0 : i32
    scf.if %2 {
      %cst_19 = arith.constant 0.000000e+00 : f32
      %22 = vector.broadcast %cst_19 : f32 to vector<1x8x128xf32>
      %c0_20 = arith.constant 0 : index
      %c0_21 = arith.constant 0 : index
      %c0_22 = arith.constant 0 : index
      %23 = vector.load %arg5[%c0_20, %c0_21, %c0_22] : memref<1x8x128xf32, #tpu.memory_space<vmem>>, vector<1x8x128xf32>
      tpu.vector_store %arg5[%c0_20, %c0_21, %c0_22], %22 {strides = array<i32>} : memref<1x8x128xf32, #tpu.memory_space<vmem>>, vector<1x8x128xf32>,
      %cst_23 = arith.constant 0.000000e+00 : f32
      %24 = vector.broadcast %cst_23 : f32 to vector<1x8x128xf32>
      %c0_24 = arith.constant 0 : index
      %c0_25 = arith.constant 0 : index
      %c0_26 = arith.constant 0 : index
      %25 = vector.load %arg6[%c0_24, %c0_25, %c0_26] : memref<1x8x128xf32, #tpu.memory_space<vmem>>, vector<1x8x128xf32>
      tpu.vector_store %arg6[%c0_24, %c0_25, %c0_26], %24 {strides = array<i32>} : memref<1x8x128xf32, #tpu.memory_space<vmem>>, vector<1x8x128xf32>,
    } else {
    }
    %c0 = arith.constant 0 : index
    %c0_1 = arith.constant 0 : index
    %3 = vector.load %arg2[%c0, %c0_1] : memref<16x128xf32, #tpu.memory_space<vmem>>, vector<16x128xf32>
    %c0_2 = arith.constant 0 : index
    %c0_3 = arith.constant 0 : index
    %4 = vector.load %arg3[%c0_2, %c0_3] : memref<16x128xf32, #tpu.memory_space<vmem>>, vector<16x128xf32>
    %c0_4 = arith.constant 0 : index
    %c0_5 = arith.constant 0 : index
    %5 = vector.load %arg4[%c0_4, %c0_5] : memref<16x128xf32, #tpu.memory_space<vmem>>, vector<16x128xf32>
    %c0_6 = arith.constant 0 : index
    %c0_7 = arith.constant 0 : index
    %c0_8 = arith.constant 0 : index
    %6 = vector.load %arg5[%c0_6, %c0_7, %c0_8] : memref<1x8x128xf32, #tpu.memory_space<vmem>>, vector<1x8x128xf32>
    %7 = arith.subf %4, %3 : vector<16x128xf32>
    %8 = arith.subf %4, %3 : vector<16x128xf32>
    %9 = arith.mulf %7, %8 : vector<16x128xf32>
    %10 = arith.mulf %9, %5 : vector<16x128xf32>
    %11 = vector.shape_cast %10 : vector<16x128xf32> to vector<2x8x128xf32>
    %cst = arith.constant dense<0.000000e+00> : vector<8x128xf32>
    %12 = vector.multi_reduction <add>, %11, %cst [0] : vector<2x8x128xf32> to vector<8x128xf32>
    %13 = vector.shape_cast %12 : vector<8x128xf32> to vector<1x8x128xf32>
    %14 = arith.addf %6, %13 : vector<1x8x128xf32>
    %c0_9 = arith.constant 0 : index
    %c0_10 = arith.constant 0 : index
    %c0_11 = arith.constant 0 : index
    %15 = vector.load %arg5[%c0_9, %c0_10, %c0_11] : memref<1x8x128xf32, #tpu.memory_space<vmem>>, vector<1x8x128xf32>
    tpu.vector_store %arg5[%c0_9, %c0_10, %c0_11], %14 {strides = array<i32>} : memref<1x8x128xf32, #tpu.memory_space<vmem>>, vector<1x8x128xf32>,
    %c0_12 = arith.constant 0 : index
    %c0_13 = arith.constant 0 : index
    %c0_14 = arith.constant 0 : index
    %16 = vector.load %arg6[%c0_12, %c0_13, %c0_14] : memref<1x8x128xf32, #tpu.memory_space<vmem>>, vector<1x8x128xf32>
    %17 = vector.shape_cast %5 : vector<16x128xf32> to vector<2x8x128xf32>
    %cst_15 = arith.constant dense<0.000000e+00> : vector<8x128xf32>
    %18 = vector.multi_reduction <add>, %17, %cst_15 [0] : vector<2x8x128xf32> to vector<8x128xf32>
    %19 = vector.shape_cast %18 : vector<8x128xf32> to vector<1x8x128xf32>
    %20 = arith.addf %16, %19 : vector<1x8x128xf32>
    %c0_16 = arith.constant 0 : index
    %c0_17 = arith.constant 0 : index
    %c0_18 = arith.constant 0 : index
    %21 = vector.load %arg6[%c0_16, %c0_17, %c0_18] : memref<1x8x128xf32, #tpu.memory_space<vmem>>, vector<1x8x128xf32>
    tpu.vector_store %arg6[%c0_16, %c0_17, %c0_18], %20 {strides = array<i32>} : memref<1x8x128xf32, #tpu.memory_space<vmem>>, vector<1x8x128xf32>,
    return
  }
  func.func @transform_0(%arg0: i32, %arg1: i32) -> (i32, i32) {
    %c1_i32 = arith.constant 1 : i32
    %0 = arith.muli %arg0, %c1_i32 : i32
    %1 = arith.addi %0, %arg1 : i32
    %c0_i32 = arith.constant 0 : i32
    %2 = arith.minsi %1, %c0_i32 : i32
    %c0_i32_0 = arith.constant 0 : i32
    %c0_i32_1 = arith.constant 0 : i32
    return %2, %c0_i32_0 : i32, i32
  }
  func.func @transform_1(%arg0: i32, %arg1: i32) -> (i32, i32) {
    %c1_i32 = arith.constant 1 : i32
    %0 = arith.muli %arg0, %c1_i32 : i32
    %1 = arith.addi %0, %arg1 : i32
    %c0_i32 = arith.constant 0 : i32
    %2 = arith.minsi %1, %c0_i32 : i32
    %c0_i32_0 = arith.constant 0 : i32
    %c0_i32_1 = arith.constant 0 : i32
    return %2, %c0_i32_0 : i32, i32
  }
  func.func @transform_2(%arg0: i32, %arg1: i32) -> (i32, i32) {
    %c1_i32 = arith.constant 1 : i32
    %0 = arith.muli %arg0, %c1_i32 : i32
    %1 = arith.addi %0, %arg1 : i32
    %c0_i32 = arith.constant 0 : i32
    %2 = arith.minsi %1, %c0_i32 : i32
    %c0_i32_0 = arith.constant 0 : i32
    %c0_i32_1 = arith.constant 0 : i32
    return %2, %c0_i32_0 : i32, i32
  }
  func.func @transform_3(%arg0: i32, %arg1: i32) -> (i32, i32, i32) {
    %c0_i32 = arith.constant 0 : i32
    %c0_i32_0 = arith.constant 0 : i32
    %c0_i32_1 = arith.constant 0 : i32
    return %arg0, %c0_i32, %c0_i32_0 : i32, i32, i32
  }
  func.func @transform_4(%arg0: i32, %arg1: i32) -> (i32, i32, i32) {
    %c0_i32 = arith.constant 0 : i32
    %c0_i32_0 = arith.constant 0 : i32
    %c0_i32_1 = arith.constant 0 : i32
    return %arg0, %c0_i32, %c0_i32_0 : i32, i32, i32
  }
}

</mosaic_0001>

<bundles_post_ra>
// kernel: tpu_custom_call.1
= control target key start
LH: loop header
LB: loop body
LE: loop exit
PB: predicated region body
PF: predicated region fallthrough
CT: control target
= control target key end

     0   :  { %10 = vsyncpa [#allocation3], 0  ;;  %s314_s0 = inlined_call_operand.hbm [shape: f32[16,128], index: 0, kind: input, shape index: {}]   ;;  %s315_s1 = inlined_call_operand.hbm [shape: f32[16,128], index: 1, kind: input, shape index: {}]   ;;  %s316_s2 = inlined_call_operand.hbm [shape: f32[16,128], index: 2, kind: input, shape index: {}]   ;;  %s317_s3 = inlined_call_operand.hbm [shape: f32[1,8,128], index: 3, kind: output, shape index: {0}]   ;;  %s318_s4 = inlined_call_operand.hbm [shape: f32[1,8,128], index: 4, kind: output, shape index: {1}]  }
   0x1   :  { %11 = vsyncpa [#allocation6], 0 }
   0x2   :  { %12 = vsyncpa [#allocation4], 0 }
   0x3   :  { %13 = vsyncpa [#allocation10], 0  ;;  %s267_s15 = smov [#allocation5]   ;;  %s268_s17 = smov [#allocation2]  }
   0x4   :  { %s43_s16 = sshll.u32 %s267_s15, 4  ;;  %s25_s18 = sshll.u32 %s268_s17, 4  ;;  %s44_s16 = int_to_ptr.vmem [resolvable:$true] %s43_s16  ;;  %s26_s18 = int_to_ptr.vmem [resolvable:$true] %s25_s18 }
   0x5   :  { %s167_s19 = scalar_lea.vmem %s44_s16, 256  ;;  %p172_p1 = scmp.lt.s32.totalorder %s44_s16, %s44_s16 }
   0x6   :  { %p168_p0 = scmp.ne.s32.totalorder %s44_s16, %s167_s19  ;;  %p173_p2 = scmp.lt.s32.totalorder %s167_s19, %s167_s19 }
   0x8   :  { %p174_p3 = por %p173_p2, %p172_p1 }
   0xa   :  { %p175_p4 = pnand %p174_p3, %p168_p0 }
   0xc   :  { %178 = shalt.err (!%p175_p4)
}
   0xd   :  { %s269_s20 = smov 128   ;;  %s270_s21 = smov 8  }
   0xe   :  { %49 = dma.hbm_to_vmem [thread:$0]  %s315_s1, 256, %s44_s16, [#allocation6], %s269_s20, %s269_s20, %s270_s21  }
   0xf   :  { %s187_s24 = scalar_lea.vmem %s26_s18, 256  ;;  %p192_p6 = scmp.lt.s32.totalorder %s26_s18, %s26_s18 }
  0x10   :  { %p188_p5 = scmp.ne.s32.totalorder %s26_s18, %s187_s24  ;;  %p193_p7 = scmp.lt.s32.totalorder %s187_s24, %s187_s24 }
  0x12   :  { %p194_p8 = por %p193_p7, %p192_p6 }
  0x14   :  { %p195_p9 = pnand %p194_p8, %p188_p5 }
  0x16   :  { %198 = shalt.err (!%p195_p9)
}
  0x17   :  { %31 = dma.hbm_to_vmem [thread:$0]  %s314_s0, 256, %s26_s18, [#allocation3], %s269_s20, %s269_s20, %s270_s21  }
  0x18   :  { %s271_s27 = smov [#allocation7]  }
  0x19   :  { %s61_s28 = sshll.u32 %s271_s27, 4  ;;  %s62_s28 = int_to_ptr.vmem [resolvable:$true] %s61_s28 }
  0x1a   :  { %s207_s29 = scalar_lea.vmem %s62_s28, 256  ;;  %p212_p11 = scmp.lt.s32.totalorder %s62_s28, %s62_s28 }
  0x1b   :  { %p208_p10 = scmp.ne.s32.totalorder %s62_s28, %s207_s29  ;;  %p213_p12 = scmp.lt.s32.totalorder %s207_s29, %s207_s29 }
  0x1d   :  { %p214_p13 = por %p213_p12, %p212_p11 }
  0x1f   :  { %p215_p0 = pnand %p214_p13, %p208_p10 }
  0x21   :  { %218 = shalt.err (!%p215_p0)
}
  0x22   :  { %67 = dma.hbm_to_vmem [thread:$0]  %s316_s2, 256, %s62_s28, [#allocation6], %s269_s20, %s269_s20, %s270_s21  }
  0x23   :  { %259 = dma.done.wait [#allocation3], 256  }
  0x24   :  { %260 = vsyncadd [#allocation3], 4294967040 }
  0x25   :  { %261 = dma.done.wait [#allocation6], 512  }
  0x26   :  { %262 = vsyncadd [#allocation6], 4294966784  ;;  %v95_v0 = vld [vmem:[#allocation2] sm:$0xff]  ;;  %v96_v1 = vld [vmem:[#allocation2 + $0x8] sm:$0xff]  ;;  %s272_s0 = smov [#allocation9]   ;;  %s273_s2 = smov [#allocation8]  }
  0x27   :  { %v97_v2 = vld [vmem:[#allocation5] sm:$0xff]  ;;  %v98_v3 = vld [vmem:[#allocation5 + $0x8] sm:$0xff]  ;;  %v99_v4 = vld [vmem:[#allocation7] sm:$0xff]  ;;  %s131_s5 = sshll.u32 %s272_s0, 4  ;;  %s121_s6 = sshll.u32 %s273_s2, 4  ;;  %s132_s5 = int_to_ptr.vmem [resolvable:$true] %s131_s5  ;;  %s122_s6 = int_to_ptr.vmem [resolvable:$true] %s121_s6 }
  0x28   :  { %v100_v5 = vld [vmem:[#allocation7 + $0x8] sm:$0xff]  ;;  %v102_v6 = vsub.f32 %v97_v2, %v95_v0  ;;  %v103_v7 = vsub.f32 %v98_v3, %v96_v1  ;;  %s219_s7 = scalar_lea.vmem %s132_s5, 128  ;;  %p224_p2 = scmp.lt.s32.totalorder %s132_s5, %s132_s5 }
  0x29   :  { %v112_v8 = vadd.f32 %v100_v5, %v99_v4  ;;  %p220_p1 = scmp.ne.s32.totalorder %s132_s5, %s219_s7  ;;  %p225_p3 = scmp.lt.s32.totalorder %s219_s7, %s219_s7 }
  0x2a   :  { %v104_v9 = vmul.f32 %v102_v6, %v102_v6  ;;  %v105_v10 = vmul.f32 %v103_v7, %v103_v7 }
  0x2b   :  { %114 = vst [vmem:[#allocation9] sm:$0xff] %v112_v8  ;;  %p226_p4 = por %p225_p3, %p224_p2 }
  0x2c   :  { %v106_v11 = vmul.f32 %v104_v9, %v99_v4  ;;  %v107_v12 = vmul.f32 %v105_v10, %v100_v5 }
  0x2d   :  { %p227_p5 = pnand %p226_p4, %p220_p1 }
  0x2f   :  { %230 = shalt.err (!%p227_p5)
}
  0x30   :  { %134 = dma.vmem_to_hbm [thread:$0]  %s132_s5, 128, %s318_s4, [#allocation10]   ;;  %v108_v13 = vadd.f32 %v107_v12, %v106_v11 }
  0x31   :  { %s239_s10 = scalar_lea.vmem %s122_s6, 128  ;;  %p244_p7 = scmp.lt.s32.totalorder %s122_s6, %s122_s6 }
  0x32   :  { %110 = vst [vmem:[#allocation8] sm:$0xff] %v108_v13  ;;  %p240_p6 = scmp.ne.s32.totalorder %s122_s6, %s239_s10  ;;  %p245_p8 = scmp.lt.s32.totalorder %s239_s10, %s239_s10 }
  0x34   :  { %p246_p9 = por %p245_p8, %p244_p7 }
  0x36   :  { %p247_p10 = pnand %p246_p9, %p240_p6 }
  0x38   :  { %250 = shalt.err (!%p247_p10)
}
  0x39   :  { %124 = dma.vmem_to_hbm [thread:$0]  %s122_s6, 128, %s317_s3, [#allocation4]  }
  0x3a   :  { %263 = dma.done.wait [#allocation4], 128  }
  0x3b   :  { %264 = vsyncadd [#allocation4], 4294967168 }
  0x3c   :  { %265 = dma.done.wait [#allocation10], 128  }
  0x3d   :  { %266 = vsyncadd [#allocation10], 4294967168 }
  0x3e   :  { %141 = vsyncpa [#allocation3], 1 }
  0x3f   :  { %142 = vsyncpa [#allocation6], 1 }
  0x40   :  { %143 = vsyncpa [#allocation4], 1 }
  0x41   :  { %144 = vsyncpa [#allocation10], 1 }

</bundles_post_ra>
